<compile_context>
chip_gen: v6e
topology: v6e:2x2x1
jax: 0.10.0
libtpu: 0.0.40
codegen_flags: <defaults>
</compile_context>

<pallas_src>
from functools import partial

import jax
import jax.numpy as jnp
from jax.experimental import pallas as pl
from jax.experimental.pallas import tpu as pltpu

N_BINS = 15       # matches _ECELoss(n_bins=15); boundaries = linspace(0, 1, 16)
LANES = 128       # lane-padded bin axis (bins live in lanes [0, n_bins))


def ece_bin_kernel(logits_ref, labels_ref, out_ref, *, n_bins, n_total, tile_n):
    logits = logits_ref[...].astype(jnp.float32)        # (TILE_N, C)
    labels = labels_ref[...]                            # (TILE_N, 1) int32
    tn, c = logits.shape

    partial_tile = (n_total % tile_n) != 0              # static (Python) guard
    if partial_tile:
        # Rows past N in the last block hold undefined data; zero the logits so
        # every downstream value stays finite, then mask contributions below.
        row_ids = (pl.program_id(0) * tile_n
                   + jax.lax.broadcasted_iota(jnp.int32, (tn, 1), 0))
        valid = (row_ids < n_total)
        logits = jnp.where(valid, logits, jnp.float32(0.0))

    # confidence = max softmax prob = 1 / sum(exp(logits - max)); softmax never
    # materialized (saves a full (TILE_N, C) divide + one f32 intermediate).
    m = jnp.max(logits, axis=-1, keepdims=True)                    # (TILE_N, 1)
    denom = jnp.sum(jnp.exp(logits - m), axis=-1, keepdims=True)   # (TILE_N, 1)
    conf = 1.0 / denom                                             # (TILE_N, 1)

    # prediction = first argmax of logits (== first argmax of softmax).
    col_ids = jax.lax.broadcasted_iota(jnp.int32, (tn, c), 1)
    pred = jnp.min(jnp.where(logits == m, col_ids, c),
                   axis=-1, keepdims=True)                         # (TILE_N, 1)
    acc = (pred == labels).astype(jnp.float32)                     # (TILE_N, 1)

    # bin index with (lo, hi] semantics: bin = clamp(ceil(conf*n_bins)-1, 0, nb-1)
    bin_idx = jnp.clip(
        jnp.ceil(conf * jnp.float32(n_bins)).astype(jnp.int32) - 1,
        0, n_bins - 1)                                             # (TILE_N, 1)

    # one-hot over a lane-dense 128-wide bin axis.
    lane = jax.lax.broadcasted_iota(jnp.int32, (tn, LANES), 1)
    onehot = (lane == bin_idx).astype(jnp.float32)                 # (TILE_N, 128)
    if partial_tile:
        onehot = onehot * valid.astype(jnp.float32)

    # Two lane-dense sublane reductions; concat only the reduced (1, 128) rows
    # (avoids the (TILE_N, 256) slab of the previous version).
    conf_sums = jnp.sum(conf * onehot, axis=0, keepdims=True)      # (1, 128)
    acc_sums = jnp.sum(acc * onehot, axis=0, keepdims=True)        # (1, 128)
    out_ref[...] = jnp.concatenate(
        [conf_sums, acc_sums], axis=-1).reshape(1, 1, 2 * LANES)


def _vmem_limit_and_budget():
    """Per-chip scoped-VMEM limit + budget for tile sizing (bytes)."""
    try:
        cap = int(pltpu.get_tpu_info().vmem_capacity_bytes)
    except Exception:
        cap = 64 * 1024 * 1024          # conservative: v7x per-TC VMEM
    limit = min(96 * 1024 * 1024, (cap * 3) // 4)   # 48 MiB on v7x, 96 on v5e/v6e
    budget = max(limit // 2, limit - 8 * 1024 * 1024)
    return limit, budget


def _choose_tile_n(n, c, itemsize, budget, mult):
    """Pick TILE_N targeting multi-MiB streaming blocks under the VMEM budget."""
    # Per-row VMEM cost: double-buffered logits (2*C*itemsize), f32 upcast +
    # exp + iota/select intermediates (~12 B per class), double-buffered
    # (TILE_N, 1) int32 labels padded to 128 lanes (1 KiB), and lane-padded
    # one-hot / column temporaries (~3 KiB, conservative).
    per_row = c * (2 * itemsize + 12) + 4096
    tile_budget = max(mult, budget // per_row)
    tile_target = max(mult, (8 * 1024 * 1024) // max(1, c * itemsize))
    tile_n = min(int(tile_budget), int(tile_target), n)
    if tile_n < n:
        tile_n = max(mult, (tile_n // mult) * mult)
        if tile_n >= n:
            tile_n = n
    # Guarantee >= 2 grid steps when there is enough data, so the "parallel"
    # axis can shard across both v7x TensorCores (no-op on v5e/v6e).
    if tile_n >= n and n > 2 * mult:
        half = -(-n // 2)                       # ceil(n / 2)
        tile_n = (-(-half // mult)) * mult      # round up to sublane multiple
        if tile_n >= n:
            tile_n = n
    return tile_n


def ece_loss(logits, labels, n_bins=N_BINS, tile_n=None):
    """logits: (N, C) float, labels: (N,) int -> (1,) float32 ECE."""
    n, c = logits.shape
    itemsize = logits.dtype.itemsize
    mult = 16 if itemsize < 4 else 8            # packed-pair sublanes for bf16/f16
    vmem_limit, budget = _vmem_limit_and_budget()

    if tile_n is None:
        tile_n = _choose_tile_n(n, c, itemsize, budget, mult)
    else:
        tile_n = min(int(tile_n), n)
        if tile_n < n:
            tile_n = max(mult, (tile_n // mult) * mult)
    num_tiles = pl.cdiv(n, tile_n)

    labels2d = labels.astype(jnp.int32).reshape(n, 1)
    kernel = partial(ece_bin_kernel, n_bins=n_bins, n_total=n, tile_n=tile_n)

    partials = pl.pallas_call(
        kernel,
        grid=(num_tiles,),
        out_shape=jax.ShapeDtypeStruct((num_tiles, 1, 2 * LANES), jnp.float32),
        in_specs=[
            pl.BlockSpec((tile_n, c), lambda i: (i, 0)),
            pl.BlockSpec((tile_n, 1), lambda i: (i, 0)),
        ],
        out_specs=pl.BlockSpec((1, 1, 2 * LANES), lambda i: (i, 0, 0)),
        compiler_params=pltpu.CompilerParams(
            dimension_semantics=("parallel",),      # independent per-tile partials
            vmem_limit_bytes=int(vmem_limit),
        ),
        cost_estimate=pl.CostEstimate(
            flops=int(6 * n * c),
            transcendentals=int(n * c),
            bytes_accessed=int(n * c * itemsize + n * 4
                               + num_tiles * 2 * LANES * 4),
        ),
    )(logits, labels2d)

    # Finalize in the wrapper: ece = sum_b |sum_conf_b - sum_acc_b| / N
    # (== |avg_conf - acc| * prop; empty bins contribute exactly 0).
    sums = jnp.sum(partials, axis=(0, 1))            # (256,)
    conf_tot = sums[:n_bins]
    acc_tot = sums[LANES:LANES + n_bins]
    ece = jnp.sum(jnp.abs(conf_tot - acc_tot)) / jnp.float32(n)
    return ece.reshape(1)                            # like torch.zeros(1) result


if __name__ == "__main__":
    key = jax.random.PRNGKey(0)
    k_logits, k_labels = jax.random.split(key)
    N, C = 100, 16                                   # small; exercises partial tile
    logits = jax.random.normal(k_logits, (N, C), dtype=jnp.float32) * 2.0
    labels = jax.random.randint(k_labels, (N,), 0, C, dtype=jnp.int32)

    # Auto tile sizing (splits into 2 tiles here; last tile is partial/masked).
    ece = ece_loss(logits, labels)
    jax.block_until_ready(ece)

    # Explicit small tile (4-tile grid) exercises the manual override path.
    ece_small = ece_loss(logits, labels, tile_n=32)
    jax.block_until_ready(ece_small)

    # Pure-JAX reference (same math as the PyTorch module).
    sm = jax.nn.softmax(logits, axis=1)
    conf = jnp.max(sm, axis=1)
    pred = jnp.argmax(sm, axis=1)
    acc = (pred == labels).astype(jnp.float32)
    ref = jnp.float32(0.0)
    for b in range(N_BINS):
        lo, hi = b / N_BINS, (b + 1) / N_BINS
        in_bin = (conf > lo) & (conf <= hi)
        cnt = jnp.sum(in_bin.astype(jnp.float32))
        prop = cnt / N
        safe = jnp.maximum(cnt, 1.0)
        a = jnp.sum(acc * in_bin) / safe
        cmean = jnp.sum(conf * in_bin) / safe
        ref = ref + jnp.where(cnt > 0, jnp.abs(cmean - a) * prop, 0.0)

    assert ece.shape == (1,)
    assert jnp.allclose(ece[0], ref, atol=1e-5), (ece, ref)
    assert jnp.allclose(ece_small[0], ref, atol=1e-5), (ece_small, ref)
    print("KERNEL_OK")
</pallas_src>

<mosaic_0001>
module attributes {stable_mosaic.version = 11 : i64} {
  func.func @ece_bin_kernel(%arg0: i32, %arg1: memref<56x16xf32, #tpu.memory_space<vmem>>, %arg2: memref<56x1xi32, #tpu.memory_space<vmem>>, %arg3: memref<1x1x256xf32, #tpu.memory_space<vmem>>) attributes {dimension_semantics = [#tpu.dimension_semantics<parallel>], iteration_bounds = array<i64: 2>, scalar_prefetch = 0 : i64, scratch_operands = 0 : i64, tpu.core_type = #tpu.core_type<tc>, window_params = [{transform_indices = @transform_0, window_bounds = array<i64: 56, 16>}, {transform_indices = @transform_1, window_bounds = array<i64: 56, 1>}, {transform_indices = @transform_2, window_bounds = array<i64: 1, 1, 256>}]} {
    %c0 = arith.constant 0 : index
    %c0_0 = arith.constant 0 : index
    %0 = vector.load %arg1[%c0, %c0_0] : memref<56x16xf32, #tpu.memory_space<vmem>>, vector<56x16xf32>
    %c0_1 = arith.constant 0 : index
    %c0_2 = arith.constant 0 : index
    %1 = vector.load %arg2[%c0_1, %c0_2] : memref<56x1xi32, #tpu.memory_space<vmem>>, vector<56x1xi32>
    %c56_i32 = arith.constant 56 : i32
    %2 = arith.muli %arg0, %c56_i32 : i32
    %3 = tpu.iota {dimensions = array<i32: 0>} : vector<56x1xi32>
    %4 = vector.broadcast %2 : i32 to vector<56x1xi32>
    %5 = arith.addi %4, %3 : vector<56x1xi32>
    %c100_i32 = arith.constant 100 : i32
    %6 = vector.broadcast %c100_i32 : i32 to vector<56x1xi32>
    %7 = arith.cmpi slt, %5, %6 : vector<56x1xi32>
    %cst = arith.constant 0.000000e+00 : f32
    %8 = vector.shape_cast %7 : vector<56x1xi1> to vector<56x1xi1>
    %9 = vector.broadcast %8 : vector<56x1xi1> to vector<56x16xi1>
    %10 = vector.broadcast %cst : f32 to vector<56x16xf32>
    %11 = arith.select %9, %0, %10 : vector<56x16xi1>, vector<56x16xf32>
    %cst_3 = arith.constant dense<0xFF800000> : vector<56xf32>
    %12 = vector.multi_reduction <maximumf>, %11, %cst_3 [1] : vector<56x16xf32> to vector<56xf32>
    %13 = vector.shape_cast %12 : vector<56xf32> to vector<56x1xf32>
    %14 = vector.broadcast %13 : vector<56x1xf32> to vector<56x16xf32>
    %15 = arith.subf %11, %14 : vector<56x16xf32>
    %16 = math.exp %15 : vector<56x16xf32>
    %cst_4 = arith.constant dense<0.000000e+00> : vector<56xf32>
    %17 = vector.multi_reduction <add>, %16, %cst_4 [1] : vector<56x16xf32> to vector<56xf32>
    %18 = vector.shape_cast %17 : vector<56xf32> to vector<56x1xf32>
    %cst_5 = arith.constant 1.000000e+00 : f32
    %19 = vector.broadcast %cst_5 : f32 to vector<56x1xf32>
    %20 = arith.divf %19, %18 : vector<56x1xf32>
    %21 = tpu.iota {dimensions = array<i32: 1>} : vector<56x16xi32>
    %22 = vector.broadcast %13 : vector<56x1xf32> to vector<56x16xf32>
    %23 = arith.cmpf oeq, %11, %22 : vector<56x16xf32>
    %c16_i32 = arith.constant 16 : i32
    %24 = vector.broadcast %c16_i32 : i32 to vector<56x16xi32>
    %25 = arith.select %23, %21, %24 : vector<56x16xi1>, vector<56x16xi32>
    %cst_6 = arith.constant dense<2147483647> : vector<56xi32>
    %26 = vector.multi_reduction <minsi>, %25, %cst_6 [1] : vector<56x16xi32> to vector<56xi32>
    %27 = vector.shape_cast %26 : vector<56xi32> to vector<56x1xi32>
    %28 = arith.cmpi eq, %27, %1 : vector<56x1xi32>
    %29 = arith.extui %28 : vector<56x1xi1> to vector<56x1xi32>
    %30 = arith.sitofp %29 : vector<56x1xi32> to vector<56x1xf32>
    %cst_7 = arith.constant 1.500000e+01 : f32
    %31 = vector.broadcast %cst_7 : f32 to vector<56x1xf32>
    %32 = arith.mulf %20, %31 : vector<56x1xf32>
    %33 = math.ceil %32 : vector<56x1xf32>
    %34 = arith.fptosi %33 : vector<56x1xf32> to vector<56x1xi32>
    %c1_i32 = arith.constant 1 : i32
    %35 = vector.broadcast %c1_i32 : i32 to vector<56x1xi32>
    %36 = arith.subi %34, %35 : vector<56x1xi32>
    %c0_i32 = arith.constant 0 : i32
    %c14_i32 = arith.constant 14 : i32
    %37 = vector.broadcast %c0_i32 : i32 to vector<56x1xi32>
    %38 = arith.maxsi %37, %36 : vector<56x1xi32>
    %39 = vector.broadcast %c14_i32 : i32 to vector<56x1xi32>
    %40 = arith.minsi %39, %38 : vector<56x1xi32>
    %41 = tpu.iota {dimensions = array<i32: 1>} : vector<56x128xi32>
    %42 = vector.broadcast %40 : vector<56x1xi32> to vector<56x128xi32>
    %43 = arith.cmpi eq, %41, %42 : vector<56x128xi32>
    %44 = arith.extui %43 : vector<56x128xi1> to vector<56x128xi32>
    %45 = arith.sitofp %44 : vector<56x128xi32> to vector<56x128xf32>
    %46 = arith.extui %7 : vector<56x1xi1> to vector<56x1xi32>
    %47 = arith.sitofp %46 : vector<56x1xi32> to vector<56x1xf32>
    %48 = vector.broadcast %47 : vector<56x1xf32> to vector<56x128xf32>
    %49 = arith.mulf %45, %48 : vector<56x128xf32>
    %50 = vector.broadcast %20 : vector<56x1xf32> to vector<56x128xf32>
    %51 = arith.mulf %50, %49 : vector<56x128xf32>
    %cst_8 = arith.constant dense<0.000000e+00> : vector<128xf32>
    %52 = vector.multi_reduction <add>, %51, %cst_8 [0] : vector<56x128xf32> to vector<128xf32>
    %53 = vector.shape_cast %52 : vector<128xf32> to vector<1x128xf32>
    %54 = vector.broadcast %30 : vector<56x1xf32> to vector<56x128xf32>
    %55 = arith.mulf %54, %49 : vector<56x128xf32>
    %cst_9 = arith.constant dense<0.000000e+00> : vector<128xf32>
    %56 = vector.multi_reduction <add>, %55, %cst_9 [0] : vector<56x128xf32> to vector<128xf32>
    %57 = vector.shape_cast %56 : vector<128xf32> to vector<1x128xf32>
    %58 = tpu.concatenate %53, %57 in 1 : vector<1x128xf32>, vector<1x128xf32> -> vector<1x256xf32>
    %59 = vector.shape_cast %58 : vector<1x256xf32> to vector<1x1x256xf32>
    %c0_10 = arith.constant 0 : index
    %c0_11 = arith.constant 0 : index
    %c0_12 = arith.constant 0 : index
    %60 = vector.load %arg3[%c0_10, %c0_11, %c0_12] : memref<1x1x256xf32, #tpu.memory_space<vmem>>, vector<1x1x256xf32>
    tpu.vector_store %arg3[%c0_10, %c0_11, %c0_12], %59 {strides = array<i32>} : memref<1x1x256xf32, #tpu.memory_space<vmem>>, vector<1x1x256xf32>,
    return
  }
  func.func @transform_0(%arg0: i32) -> (i32, i32) {
    %c0_i32 = arith.constant 0 : i32
    %c0_i32_0 = arith.constant 0 : i32
    return %arg0, %c0_i32 : i32, i32
  }
  func.func @transform_1(%arg0: i32) -> (i32, i32) {
    %c0_i32 = arith.constant 0 : i32
    %c0_i32_0 = arith.constant 0 : i32
    return %arg0, %c0_i32 : i32, i32
  }
  func.func @transform_2(%arg0: i32) -> (i32, i32, i32) {
    %c0_i32 = arith.constant 0 : i32
    %c0_i32_0 = arith.constant 0 : i32
    %c0_i32_1 = arith.constant 0 : i32
    return %arg0, %c0_i32, %c0_i32_0 : i32, i32, i32
  }
}

</mosaic_0001>

<bundles_post_ra>
// kernel: tpu_custom_call.1
= control target key start
LH: loop header
LB: loop body
LE: loop exit
PB: predicated region body
PF: predicated region fallthrough
CT: control target
= control target key end

     0   :  { %7 = vsyncpa [#allocation3], 0  ;;  %s1315_s0 = inlined_call_operand.vmem [shape: f32[100,16], index: 0, kind: input, shape index: {}]   ;;  %s1316_s1 = inlined_call_operand.vmem [shape: s32[100,1], index: 1, kind: input, shape index: {}]   ;;  %s1317_s2 = inlined_call_operand.hbm [shape: f32[2,1,256], index: 2, kind: output, shape index: {}]  }
   0x1   :  { %9 = vsyncpa [#allocation3 + $0x1], 0  ;;  %s971_s9 = smov 0   ;;  %s973_s10 = smov 0  }
   0x2   :  { %s975_s11 = smov 0   ;;  %s977_s12 = smov 0  }
   0x3 LB: > { %s992_s13 = sadd.s32 4294967295, %s950_s12   ;;  %s758_s14 = sadd.s32 4294967294, %s950_s12   ;;  %s950_s12 = sphi %s977_s12, %s1323_s12   ;;  %s946_s11 = sphi %s975_s11, %s1322_s11   ;;  %s942_s10 = sphi %s973_s10, %s1321_s10   ;;  %s938_s9 = sphi %s971_s9, %s1320_s9  }
   0x4   : > { %s996_s15 = sadd.s32 1, %s950_s12   ;;  %s74_s16 = sadd.s32 1, %s946_s11 }
   0x5   : > { %s71_s17 = ssub.s32 %s950_s12, %s996_s15  ;;  %p84_p0 = scmp.ne.s32.totalorder %s946_s11, %s942_s10 }
   0x6   : > { %p72_p1 = scmp.eq.s32.totalorder %s71_s17, 0  ;;  %p85_p2 = scmp.eq.s32.totalorder %s992_s13, 1 }
   0x7   : > { %p90_p3 = scmp.ne.s32.totalorder %s942_s10, %s938_s9  ;;  %p91_p4 = scmp.eq.s32.totalorder %s758_s14, 1 }
   0x8   : > { %s1007_s18 = scalar_select %p72_p1, %s946_s11, %s74_s16  }
   0x9   : > { %p1009_p5 = por %p85_p2, %p84_p0  ;;  %p1013_p6 = por %p91_p4, %p90_p3 }
   0xa   : > { %p761_p7 = scmp.ge.s32.totalorder %s950_s12, 1  ;;  %p143_p8 = scmp.lt.s32.totalorder %s950_s12, 3 }
   0xc   : > { %p144_p9 = pnand %p761_p7, %p143_p8 }
   0xd   : > { %s178_s21 = smul.u32 (!%p144_p9), 7, %s992_s13  ;;  %s175_s30 = sand.u32 (!%p144_p9), 1, %s942_s10  }
   0xe   : > { %147 = sbr.rel (%p144_p9) target bundleno = 636 (0x27c), region = 28  ;;  %s762_s3 = sshll.u32 (!%p144_p9), %s175_s30, 1 }
   0xf   : > { %s220_s22 = smul.u32 (!%p144_p9), 56, %s992_s13  ;;  %p183_p10 = scmp.lt.s32.totalorder (!%p144_p9), %s178_s21, 12 }
  0x10   : > { %s798_s4 = sshll.u32 (!%p144_p9), %s992_s13, 5  ;;  %s177_s5 = scalar_lea.vmem (!%p144_p9), [#allocation2], %s762_s3 }
  0x11   : > { %s687_s6 = sshll.u32 (!%p144_p9), %s177_s5, 4  ;;  %s685_s14 = scalar_lea.hbm (!%p144_p9), %s1317_s2, %s798_s4  ;;  %s688_s6 = int_to_ptr.vmem [resolvable:$true] %s687_s6 }
  0x12   : > { %s673_s16 = scalar_lea.sflag (!%p144_p9), [#allocation3], %s175_s30  ;;  %s890_s17 = scalar_lea.vmem (!%p144_p9), %s688_s6, 32 }
  0x13   : > { %v221_v0 = vlaneseq  ;;  %v229_v2 = vstv %s220_s22  ;;  %s1325_s21 = smov (!%p183_p10, %s178_s21), 12  ;;  %vm265_vm1 = vcmask 130048   ;;  %p891_p11 = scmp.ne.s32.totalorder %s688_s6, %s890_s17 }
  0x14   : > { %s763_s23 = sshll.u32 %s1325_s21, 3  ;;  %s955_s21 = smov [#allocation2]  }
  0x15   : > { %v1022_v1 = vshrl.u32 %v221_v0, 7  ;;  %s186_s26 = scalar_lea.vmem %s1315_s0, %s763_s23  ;;  %v1103_v37 = vand.u32 127, %v221_v0  ;;  %s1197_s29 = scalar_lea.vmem %s1316_s1, %s763_s23 }
  0x16   : > { %v206_v15 = vld [vmem:[%s186_s26] sm:$0xff]  ;;  %v208_v16 = vld [vmem:[%s186_s26 + $0x10] sm:$0xff]  ;;  %v207_v17 = vld [vmem:[%s186_s26 + $0x8] sm:$0xff]  ;;  %p892_p12 = pnand %p891_p11, %p1009_p5  ;;  %s894_s13 = sshll.u32 %s955_s21, 4  ;;  %s895_s13 = int_to_ptr.vmem [resolvable:$false] %s894_s13 }
  0x17   : > { %v1027_v3 = vadd.s32 %v229_v2, %v1022_v1  ;;  %v224_v4 = vadd.s32 16, %v1022_v1  ;;  %v223_v5 = vadd.s32 8, %v1022_v1  ;;  %v225_v6 = vadd.s32 24, %v1022_v1  ;;  %v209_v21 = vld [vmem:[%s186_s26 + $0x18] sm:$0xff]  ;;  %v210_v25 = vld [vmem:[%s186_s26 + $0x20] sm:$0xff]  ;;  %v211_v26 = vld [vmem:[%s186_s26 + $0x28] sm:$0xff]  ;;  %p897_p0 = scmp.lt.s32.totalorder %s688_s6, %s895_s13 }
  0x18   : > { %v226_v7 = vadd.s32 32, %v1022_v1  ;;  %v227_v8 = vadd.s32 40, %v1022_v1  ;;  %v228_v9 = vadd.s32 48, %v1022_v1  ;;  %v212_v32 = vld [vmem:[%s186_s26 + $0x30] sm:$0xff]  ;;  %p893_p13 = pneg %p892_p12  ;;  %s896_s22 = scalar_lea.vmem %s895_s13, 64 }
  0x19   : > { %vm237_vm0 = vcmp.lt.s32.totalorder %v1027_v3, 100  ;;  %v1037_v10 = vadd.s32 %v229_v2, %v224_v4  ;;  %v1039_v11 = vadd.s32 %v229_v2, %v223_v5  ;;  %v1041_v12 = vadd.s32 %v229_v2, %v225_v6  ;;  %p898_p1 = scmp.lt.s32.totalorder %s896_s22, %s890_s17 }
  0x1a   : > { %v1048_v13 = vadd.s32 %v229_v2, %v226_v7  ;;  %v1050_v14 = vadd.s32 %v229_v2, %v227_v8  ;;  %v1057_v18 = vsel %vm237_vm0, %v206_v15, 0.0  ;;  %v1075_v27 = vadd.s32 %v229_v2, %v228_v9 }
  0x1b   : > { %vm239_vm2 = vcmp.lt.s32.totalorder %v1037_v10, 100  ;;  %vm238_vm3 = vcmp.lt.s32.totalorder %v1039_v11, 100  ;;  %vm240_vm4 = vcmp.lt.s32.totalorder %v1041_v12, 100  ;;  %v266_v22 = vsel %vm265_vm1, %v1057_v18, -inf  ;;  %p899_p2 = por %p898_p1, %p897_p0 }
  0x1c   : > { %v1061_v19 = vsel %vm239_vm2, %v208_v16, 0.0  ;;  %v1065_v20 = vsel %vm238_vm3, %v207_v17, 0.0  ;;  %v1073_v24 = vsel %vm240_vm4, %v209_v21, 0.0  ;;  %267 = vmax.xlane.f32.xlu0 %v266_v22  ;;  %vm241_vm5 = vcmp.lt.s32.totalorder %v1048_v13, 100 }
  0x1d   : > { %v272_v23 = vsel %vm265_vm1, %v1061_v19, -inf  ;;  %vm242_vm6 = vcmp.lt.s32.totalorder %v1050_v14, 100  ;;  %v269_v28 = vsel %vm265_vm1, %v1065_v20, -inf  ;;  %v275_v29 = vsel %vm265_vm1, %v1073_v24, -inf  ;;  %p900_p3 = pnand %p899_p2, %p893_p13 }
  0x1e   : > { %273 = vmax.xlane.f32.xlu1 %v272_v23  ;;  %v1085_v30 = vsel %vm241_vm5, %v210_v25, 0.0  ;;  %v1089_v31 = vsel %vm242_vm6, %v211_v26, 0.0  ;;  %vm243_vm7 = vcmp.lt.s32.totalorder %v1075_v27, 100 }
  0x1f   : > { %v278_v33 = vsel %vm265_vm1, %v1085_v30, -inf  ;;  %v281_v34 = vsel %vm265_vm1, %v1089_v31, -inf  ;;  %v1098_v35 = vsel %vm243_vm7, %v212_v32, 0.0 }
  0x20   : > { %270 = vmax.xlane.f32.xlu0 %v269_v28  ;;  %v284_v36 = vsel %vm265_vm1, %v1098_v35, -inf }
  0x22   : > { %276 = vmax.xlane.f32.xlu1 %v275_v29 }
  0x24   : > { %279 = vmax.xlane.f32.xlu0 %v278_v33 }
  0x26   : > { %282 = vmax.xlane.f32.xlu1 %v281_v34 }
  0x28   : > { %285 = vmax.xlane.f32.xlu0 %v284_v36 }
  0xa5   : > { %v268_v38 = vpop.xlane.xlu0 %267 }
  0xa6   : > { %vm345_vm8 = vcmp.eq.f32.partialorder %v1057_v18, %v268_v38  ;;  %v287_v22 = vsub.f32 %v1057_v18, %v268_v38 }
  0xa7   : > { %v1105_v39 = vpop.xlane.xlu1 %273  ;;  %v352_v40 = vsel %vm345_vm8, %v1103_v37, 16 }
  0xa8   : > { %vm347_vm9 = vcmp.eq.f32.partialorder %v1061_v19, %v1105_v39  ;;  %v359_v42 = vsel %vm265_vm1, %v352_v40, 2147483647  ;;  %v294_v32 = vmul.f32 1.442695, %v287_v22  ;;  %v289_v33 = vsub.f32 %v1061_v19, %v1105_v39 }
  0xa9   : > { %v354_v41 = vsel %vm347_vm9, %v1103_v37, 16  ;;  %v271_v43 = vpop.xlane.xlu0 %270  ;;  %v361_v45 = vshra.s32 %v359_v42, 16  ;;  %v360_v21 = vand.u32 65535, %v359_v42 }
  0xaa   : > { %v389_v46 = vsel %vm265_vm1, %v354_v41, 2147483647  ;;  %vm346_vm10 = vcmp.eq.f32.partialorder %v1065_v20, %v271_v43  ;;  %v288_v17 = vsub.f32 %v1065_v20, %v271_v43  ;;  %v298_v40 = vmul.f32 1.442695, %v289_v33 }
  0xab   : > { %v277_v44 = vpop.xlane.xlu1 %276  ;;  %v353_v47 = vsel %vm346_vm10, %v1103_v37, 16  ;;  %v363_v48 = vcvt.s32.f32 %v361_v45  ;;  %v391_v50 = vshra.s32 %v389_v46, 16  ;;  %v362_v28 = vcvt.s32.f32 %v360_v21 }
  0xac   : > { %vm348_vm11 = vcmp.eq.f32.partialorder %v1073_v24, %v277_v44  ;;  %v374_v53 = vsel %vm265_vm1, %v353_v47, 2147483647  ;;  %v296_v23 = vmul.f32 1.442695, %v288_v17  ;;  %v290_v25 = vsub.f32 %v1073_v24, %v277_v44 }
  0xad   : > { %v355_v49 = vsel %vm348_vm11, %v1103_v37, 16  ;;  %364 = vmin.xlane.f32.xlu1 %v363_v48  ;;  %v1118_v51 = vpop.xlane.xlu0 %279  ;;  %v393_v56 = vcvt.s32.f32 %v391_v50  ;;  %v376_v58 = vshra.s32 %v374_v53, 16  ;;  %v390_v29 = vand.u32 65535, %v389_v46 }
  0xae   : > { %vm349_vm12 = vcmp.eq.f32.partialorder %v1085_v30, %v1118_v51  ;;  %v1124_v54 = vsel %vm265_vm1, %v355_v49, 2147483647  ;;  %v375_v36 = vand.u32 65535, %v374_v53  ;;  %862 = vpow2.f32 %v296_v23 }
  0xaf   : > { %v283_v52 = vpop.xlane.xlu1 %282  ;;  %v356_v55 = vsel %vm349_vm12, %v1103_v37, 16  ;;  %v406_v60 = vshra.s32 %v1124_v54, 16  ;;  %v378_v63 = vcvt.s32.f32 %v376_v58  ;;  %v300_v20 = vmul.f32 1.442695, %v290_v25 }
  0xb0   : > { %vm350_vm13 = vcmp.eq.f32.partialorder %v1089_v31, %v283_v52  ;;  %v419_v61 = vsel %vm265_vm1, %v356_v55, 2147483647  ;;  %v292_v18 = vsub.f32 %v1089_v31, %v283_v52  ;;  %v392_v24 = vcvt.s32.f32 %v390_v29 }
  0xb1   : > { %v357_v57 = vsel %vm350_vm13, %v1103_v37, 16  ;;  %394 = vmin.xlane.f32.xlu1 %v393_v56  ;;  %v1129_v59 = vpop.xlane.xlu0 %285  ;;  %v421_v4 = vshra.s32 %v419_v61, 16  ;;  %379 = vmin.xlane.f32.xlu0 %v378_v63  ;;  %v408_v5 = vcvt.s32.f32 %v406_v60  ;;  %864 = vpow2.f32 %v294_v32 }
  0xb2   : > { %v1134_v62 = vsel %vm265_vm1, %v357_v57, 2147483647  ;;  %vm351_vm14 = vcmp.eq.f32.partialorder %v1098_v35, %v1129_v59  ;;  %v291_v41 = vsub.f32 %v1085_v30, %v1118_v51  ;;  %v420_v39 = vand.u32 65535, %v419_v61 }
  0xb3   : > { %v358_v2 = vsel %vm351_vm14, %v1103_v37, 16  ;;  %v436_v6 = vshra.s32 %v1134_v62, 16  ;;  %v423_v8 = vcvt.s32.f32 %v421_v4  ;;  %v377_v43 = vcvt.s32.f32 %v375_v36 }
  0xb4   : > { %v449_v7 = vsel %vm265_vm1, %v358_v2, 2147483647  ;;  %v405_v44 = vand.u32 65535, %v1124_v54  ;;  %866 = vpow2.f32 %v300_v20  ;;  %v304_v31 = vmul.f32 1.442695, %v292_v18  ;;  %v215_v18 = vld [vmem:[%s1197_s29 + $0x10] sm:$0xff] }
  0xb5   : > { %v451_v9 = vshra.s32 %v449_v7, 16  ;;  %424 = vmin.xlane.f32.xlu1 %v423_v8  ;;  %409 = vmin.xlane.f32.xlu0 %v408_v5  ;;  %v1143_v16 = vcvt.s32.f32 %v436_v6  ;;  %868 = vpow2.f32 %v298_v40  ;;  %v302_v45 = vmul.f32 1.442695, %v291_v41 }
  0xb6   : > { %v293_v46 = vsub.f32 %v1098_v35, %v1129_v59  ;;  %v450_v49 = vand.u32 65535, %v449_v7  ;;  %v407_v51 = vcvt.s32.f32 %v405_v44  ;;  %v435_v52 = vand.u32 65535, %v1134_v62 }
  0xb7   : > { %v1141_v15 = vcvt.s32.f32 %v451_v9  ;;  %870 = vpow2.f32 %v304_v31 }
  0xb8   : > { %872 = vpow2.f32 %v302_v45  ;;  %v306_v54 = vmul.f32 1.442695, %v293_v46  ;;  %v437_v58 = vcvt.s32.f32 %v435_v52  ;;  %v953_v45 = vmov 0.0  }
  0xb9   : > { %454 = vmin.xlane.f32.xlu1 %v1141_v15  ;;  %439 = vmin.xlane.f32.xlu0 %v1143_v16 }
  0xba   : > { %874 = vpow2.f32 %v306_v54  ;;  %v216_v54 = vld [vmem:[%s1197_s29 + $0x18] sm:$0xff] }
  0xbb   : > { %v863_v60 = vpop.eup %862 }
  0xbe   : > { %v865_v62 = vpop.eup %864 }
  0xbf   : > { %v308_v4 = vsel %vm265_vm1, %v865_v62, 0.0 }
  0xc1   : > { %v867_v2 = vpop.eup %866 }
  0xc2   : > { %v317_v6 = vsel %vm265_vm1, %v867_v2, 0.0 }
 0x136   : > { %v1150_v26 = vpop.xlane.xlu1 %364 }
 0x137   : > { %vm366_vm15 = vcmp.eq.f32.partialorder %v363_v48, %v1150_v26  ;;  %v422_v48 = vcvt.s32.f32 %v420_v39  ;;  %v371_v23 = vcvt.f32.s32 %v1150_v26 }
 0x138   : > { %v367_v34 = vsel %vm366_vm15, %v362_v28, inf }
 0x139   : > { %368 = vmin.xlane.f32.xlu0 %v367_v34  ;;  %v372_v32 = vshll.u32 %v371_v23, 16 }
 0x13a   : > { %v1156_v38 = vpop.xlane.xlu1 %394  ;;  %v1161_v42 = vpop.xlane.xlu0 %379 }
 0x13b   : > { %vm396_vm8 = vcmp.eq.f32.partialorder %v393_v56, %v1156_v38  ;;  %vm381_vm9 = vcmp.eq.f32.partialorder %v378_v63, %v1161_v42  ;;  %v452_v56 = vcvt.s32.f32 %v450_v49  ;;  %v311_v63 = vsel %vm265_vm1, %v863_v60, 0.0 }
 0x13c   : > { %v397_v19 = vsel %vm396_vm8, %v392_v24, inf  ;;  %v382_v30 = vsel %vm381_vm9, %v377_v43, inf  ;;  %v401_v28 = vcvt.f32.s32 %v1156_v38  ;;  %v386_v33 = vcvt.f32.s32 %v1161_v42  ;;  %v213_v24 = vld [vmem:[%s1197_s29] sm:$0xff]  ;;  %v214_v43 = vld [vmem:[%s1197_s29 + $0x8] sm:$0xff] }
 0x13d   : > { %398 = vmin.xlane.f32.xlu0 %v397_v19  ;;  %383 = vmin.xlane.f32.xlu1 %v382_v30 }
 0x13e   : > { %v1167_v47 = vpop.xlane.xlu1 %424  ;;  %v1169_v50 = vpop.xlane.xlu0 %409  ;;  %v402_v36 = vshll.u32 %v401_v28, 16  ;;  %v387_v19 = vshll.u32 %v386_v33, 16 }
 0x13f   : > { %vm426_vm10 = vcmp.eq.f32.partialorder %v423_v8, %v1167_v47  ;;  %vm411_vm11 = vcmp.eq.f32.partialorder %v408_v5, %v1169_v50  ;;  %v869_v5 = vpop.eup %868  ;;  %v431_v38 = vcvt.f32.s32 %v1167_v47  ;;  %v416_v39 = vcvt.f32.s32 %v1169_v50 }
 0x140   : > { %v427_v53 = vsel %vm426_vm10, %v422_v48, inf  ;;  %v412_v35 = vsel %vm411_vm11, %v407_v51, inf  ;;  %v871_v7 = vpop.eup %870  ;;  %v314_v8 = vsel %vm265_vm1, %v869_v5, 0.0 }
 0x141   : > { %428 = vmin.xlane.f32.xlu0 %v427_v53  ;;  %413 = vmin.xlane.f32.xlu1 %v412_v35  ;;  %v873_v9 = vpop.eup %872  ;;  %v432_v30 = vshll.u32 %v431_v38, 16  ;;  %v417_v49 = vshll.u32 %v416_v39, 16 }
 0x142   : > { %v1174_v55 = vpop.xlane.xlu1 %454  ;;  %v1176_v57 = vpop.xlane.xlu0 %439  ;;  %v320_v17 = vsel %vm265_vm1, %v873_v9, 0.0 }
 0x143   : > { %vm456_vm12 = vcmp.eq.f32.partialorder %v1141_v15, %v1174_v55  ;;  %vm441_vm13 = vcmp.eq.f32.partialorder %v1143_v16, %v1176_v57  ;;  %v952_v15 = vmov 0   ;;  %v323_v16 = vsel %vm265_vm1, %v871_v7, 0.0  ;;  %v875_v21 = vpop.eup %874 }
 0x144   : > { %v457_v59 = vsel %vm456_vm12, %v452_v56, inf  ;;  %v442_v61 = vsel %vm441_vm13, %v437_v58, inf  ;;  %861 = vset.pattern.permute.xlu1 %v952_v15  ;;  %855 = vset.pattern.permute.xlu0 %v952_v15  ;;  %v326_v22 = vsel %vm265_vm1, %v875_v21, 0.0  ;;  %v446_v51 = vcvt.f32.s32 %v1176_v57 }
 0x145   : > { %458 = vmin.xlane.f32.xlu0 %v457_v59  ;;  %443 = vmin.xlane.f32.xlu1 %v442_v61  ;;  %v217_v61 = vld [vmem:[%s1197_s29 + $0x20] sm:$0xff]  ;;  %v461_v62 = vcvt.f32.s32 %v1174_v55 }
 0x147   : > { %v462_v9 = vshll.u32 %v461_v62, 16 }
 0x149   : > { %312 = vadd.xlane.f32.xlu0 %v311_v63  ;;  %309 = vadd.xlane.f32.xlu1 %v308_v4  ;;  %v447_v63 = vshll.u32 %v446_v51, 16 }
 0x14d   : > { %318 = vadd.xlane.f32.xlu0 %v317_v6  ;;  %315 = vadd.xlane.f32.xlu1 %v314_v8  ;;  %v218_v8 = vld [vmem:[%s1197_s29 + $0x28] sm:$0xff] }
 0x151   : > { %324 = vadd.xlane.f32.xlu0 %v323_v16  ;;  %321 = vadd.xlane.f32.xlu1 %v320_v17  ;;  %v219_v16 = vld [vmem:[%s1197_s29 + $0x30] sm:$0xff] }
 0x155   : > { %327 = vadd.xlane.f32.xlu1 %v326_v22 }
 0x1c2   : > { %v369_v25 = vpop.xlane.xlu0 %368 }
 0x1c3   : > { %v370_v29 = vcvt.f32.s32 %v369_v25 }
 0x1c5   : > { %v373_v26 = vadd.s32 %v372_v32, %v370_v29 }
 0x1c6   : > { %v399_v34 = vpop.xlane.xlu0 %398  ;;  %v384_v40 = vpop.xlane.xlu1 %383 }
 0x1c7   : > { %v400_v20 = vcvt.f32.s32 %v399_v34  ;;  %v385_v42 = vcvt.f32.s32 %v384_v40  ;;  %vm464_vm14 = vcmp.eq.s32.totalorder %v373_v26, %v213_v24  ;;  %v787_v40 = vsel %vm238_vm3, 1.0, %v953_v45 }
 0x1c8   : > { %v765_v52 = vsel %vm464_vm14, 1.0, %v953_v45 }
 0x1c9   : > { %v403_v41 = vadd.s32 %v402_v36, %v400_v20  ;;  %v388_v44 = vadd.s32 %v387_v19, %v385_v42  ;;  %v786_v19 = vsel %vm237_vm0, 1.0, %v953_v45 }
 0x1ca   : > { %v429_v31 = vpop.xlane.xlu0 %428  ;;  %v414_v48 = vpop.xlane.xlu1 %413 }
 0x1cb   : > { %vm466_vm1 = vcmp.eq.s32.totalorder %v403_v41, %v215_v18  ;;  %v430_v47 = vcvt.f32.s32 %v429_v31  ;;  %vm465_vm15 = vcmp.eq.s32.totalorder %v388_v44, %v214_v43  ;;  %v415_v50 = vcvt.f32.s32 %v414_v48 }
 0x1cc   : > { %v767_v46 = vsel %vm466_vm1, 1.0, %v953_v45  ;;  %v766_v53 = vsel %vm465_vm15, 1.0, %v953_v45 }
 0x1cd   : > { %607 = vperm.xlu1 %861, %v767_v46   ;;  %v418_v35 = vadd.s32 %v417_v49, %v415_v50  ;;  %v433_v56 = vadd.s32 %v432_v30, %v430_v47  ;;  %v856_v59 = vpack.i.bf16 %v766_v53, %v765_v52 }
 0x1ce   : > { %v459_v58 = vpop.xlane.xlu0 %458  ;;  %v444_v60 = vpop.xlane.xlu1 %443 }
 0x1cf   : > { %v445_v2 = vcvt.f32.s32 %v444_v60  ;;  %857 = vperm.xlu0 %855, %v856_v59   ;;  %vm467_vm8 = vcmp.eq.s32.totalorder %v418_v35, %v216_v54  ;;  %v460_v5 = vcvt.f32.s32 %v459_v58  ;;  %vm468_vm9 = vcmp.eq.s32.totalorder %v433_v56, %v217_v61 }
 0x1d0   : > { %v768_v57 = vsel %vm467_vm8, 1.0, %v953_v45  ;;  %v769_v15 = vsel %vm468_vm9, 1.0, %v953_v45 }
 0x1d1   : > { %v448_v4 = vadd.s32 %v447_v63, %v445_v2  ;;  %612 = vperm.xlu1 %861, %v768_v57   ;;  %v463_v55 = vadd.s32 %v462_v9, %v460_v5 }
 0x1d2   : > { %v313_v6 = vpop.xlane.xlu0 %312  ;;  %v310_v7 = vpop.xlane.xlu1 %309 }
 0x1d3   : > { %876 = vrcp.f32 %v313_v6  ;;  %vm469_vm10 = vcmp.eq.s32.totalorder %v448_v4, %v218_v8  ;;  %vm470_vm11 = vcmp.eq.s32.totalorder %v463_v55, %v219_v16 }
 0x1d4   : > { %878 = vrcp.f32 %v310_v7  ;;  %v770_v17 = vsel %vm469_vm10, 1.0, %v953_v45  ;;  %v771_v21 = vsel %vm470_vm11, 1.0, %v953_v45 }
 0x1d5   : > { %617 = vperm.xlu1 %861, %v769_v15  }
 0x1d6   : > { %v316_v3 = vpop.xlane.xlu1 %315  ;;  %v319_v48 = vpop.xlane.xlu0 %318 }
 0x1d7   : > { %880 = vrcp.f32 %v316_v3 }
 0x1d8   : > { %882 = vrcp.f32 %v319_v48 }
 0x1d9   : > { %622 = vperm.xlu1 %861, %v770_v17  }
 0x1da   : > { %v322_v47 = vpop.xlane.xlu1 %321  ;;  %v325_v49 = vpop.xlane.xlu0 %324 }
 0x1db   : > { %884 = vrcp.f32 %v322_v47 }
 0x1dc   : > { %886 = vrcp.f32 %v325_v49  ;;  %v791_v49 = vsel %vm242_vm6, 1.0, %v953_v45 }
 0x1dd   : > { %627 = vperm.xlu1 %861, %v771_v21  }
 0x1de   : > { %v328_v50 = vpop.xlane.xlu1 %327 }
 0x1df   : > { %888 = vrcp.f32 %v328_v50 }
 0x1e0   : > { %v877_v22 = vpop.eup %876 }
 0x1e1   : > { %v879_v23 = vpop.eup %878  ;;  %v486_v25 = vmul.f32 15.0, %v877_v22 }
 0x1e2   : > { %v485_v28 = vmul.f32 15.0, %v879_v23 }
 0x1e3   : > { %v493_v29 = vceil.f32 %v486_v25 }
 0x1e4   : > { %v492_v32 = vceil.f32 %v485_v28  ;;  %v881_v51 = vpop.eup %880 }
 0x1e5   : > { %v801_v33 = vtrunc.f32 %v493_v29  ;;  %v487_v52 = vmul.f32 15.0, %v881_v51  ;;  %v1235_v53 = vpop.eup %882 }
 0x1e6   : > { %v799_v34 = vtrunc.f32 %v492_v32  ;;  %v488_v56 = vmul.f32 15.0, %v1235_v53 }
 0x1e7   : > { %v802_v36 = vcvt.f32.s32 %v801_v33  ;;  %v494_v54 = vceil.f32 %v487_v52 }
 0x1e8   : > { %v800_v20 = vcvt.f32.s32 %v799_v34  ;;  %v1237_v35 = vpop.eup %884  ;;  %v495_v60 = vceil.f32 %v488_v56 }
 0x1e9   : > { %v773_v26 = vadd.s32 4294967295, %v802_v36  ;;  %v803_v58 = vtrunc.f32 %v494_v54  ;;  %v489_v59 = vmul.f32 15.0, %v1237_v35  ;;  %v1241_v61 = vpop.eup %886 }
 0x1ea   : > { %v772_v18 = vadd.s32 4294967295, %v800_v20  ;;  %v805_v57 = vtrunc.f32 %v495_v60  ;;  %v490_v4 = vmul.f32 15.0, %v1241_v61 }
 0x1eb   : > { %vm515_vm12 = vcmp.gt.s32.totalorder %v773_v26, 0  ;;  %v804_v62 = vcvt.f32.s32 %v803_v58  ;;  %v496_v63 = vceil.f32 %v489_v59 }
 0x1ec   : > { %vm513_vm13 = vcmp.gt.s32.totalorder %v772_v18, 0  ;;  %v516_v38 = vsel %vm515_vm12, %v773_v26, 0  ;;  %v1243_v2 = vpop.eup %888  ;;  %v806_v8 = vcvt.f32.s32 %v805_v57  ;;  %v497_v9 = vceil.f32 %v490_v4 }
 0x1ed   : > { %v514_v24 = vsel %vm513_vm13, %v772_v18, 0  ;;  %vm529_vm1 = vcmp.lt.s32.totalorder %v516_v38, 14  ;;  %v774_v5 = vadd.s32 4294967295, %v804_v62  ;;  %v807_v6 = vtrunc.f32 %v496_v63 }
 0x1ee   : > { %vm527_vm14 = vcmp.lt.s32.totalorder %v514_v24, 14  ;;  %v530_v41 = vsel %vm529_vm1, %v516_v38, 14  ;;  %v491_v7 = vmul.f32 15.0, %v1243_v2  ;;  %v775_v16 = vadd.s32 4294967295, %v806_v8 }
 0x1ef   : > { %v528_v39 = vsel %vm527_vm14, %v514_v24, 14  ;;  %vm542_vm15 = vcmp.eq.s32.totalorder %v1103_v37, %v530_v41  ;;  %vm517_vm0 = vcmp.gt.s32.totalorder %v774_v5, 0  ;;  %v808_v15 = vcvt.f32.s32 %v807_v6 }
 0x1f0   : > { %vm541_vm8 = vcmp.eq.s32.totalorder %v1103_v37, %v528_v39  ;;  %v780_v42 = vsel %vm542_vm15, 1.0, %v953_v45  ;;  %v498_v55 = vceil.f32 %v491_v7  ;;  %v809_v17 = vtrunc.f32 %v497_v9 }
 0x1f1   : > { %v779_v43 = vsel %vm541_vm8, 1.0, %v953_v45  ;;  %v1227_v44 = vmul.f32 %v787_v40, %v780_v42  ;;  %v518_v21 = vsel %vm517_vm0, %v774_v5, 0  ;;  %vm519_vm9 = vcmp.gt.s32.totalorder %v775_v16, 0 }
 0x1f2   : > { %v1229_v31 = vmul.f32 %v786_v19, %v779_v43  ;;  %vm531_vm3 = vcmp.lt.s32.totalorder %v518_v21, 14  ;;  %v810_v25 = vcvt.f32.s32 %v809_v17  ;;  %v520_v32 = vsel %vm519_vm9, %v775_v16, 0 }
 0x1f3   : > { %v577_v11 = vmul.f32 %v877_v22, %v1227_v44  ;;  %v776_v22 = vadd.s32 4294967295, %v808_v15  ;;  %v532_v29 = vsel %vm531_vm3, %v518_v21, 14  ;;  %vm533_vm12 = vcmp.lt.s32.totalorder %v520_v32, 14 }
 0x1f4   : > { %v576_v46 = vmul.f32 %v879_v23, %v1229_v31  ;;  %v811_v23 = vtrunc.f32 %v498_v55  ;;  %v777_v33 = vadd.s32 4294967295, %v810_v25  ;;  %vm543_vm11 = vcmp.eq.s32.totalorder %v1103_v37, %v532_v29 }
 0x1f5   : > { %vm521_vm10 = vcmp.gt.s32.totalorder %v776_v22, 0  ;;  %v781_v20 = vsel %vm543_vm11, 1.0, %v953_v45  ;;  %v788_v26 = vsel %vm239_vm2, 1.0, %v953_v45  ;;  %v534_v18 = vsel %vm533_vm12, %v520_v32, 14 }
 0x1f6   : > { %v1233_v30 = vadd.f32 %v577_v11, %v576_v46  ;;  %v812_v28 = vcvt.f32.s32 %v811_v23  ;;  %v522_v34 = vsel %vm521_vm10, %v776_v22, 0  ;;  %vm523_vm1 = vcmp.gt.s32.totalorder %v777_v33, 0 }
 0x1f7   : > { %vm535_vm13 = vcmp.lt.s32.totalorder %v522_v34, 14  ;;  %v524_v24 = vsel %vm523_vm1, %v777_v33, 0  ;;  %v571_v40 = vmul.f32 %v788_v26, %v781_v20  ;;  %vm544_vm15 = vcmp.eq.s32.totalorder %v1103_v37, %v534_v18 }
 0x1f8   : > { %v778_v36 = vadd.s32 4294967295, %v812_v28  ;;  %v536_v38 = vsel %vm535_vm13, %v522_v34, 14  ;;  %vm537_vm0 = vcmp.lt.s32.totalorder %v524_v24, 14  ;;  %v789_v19 = vsel %vm240_vm4, 1.0, %v953_v45 }
 0x1f9   : > { %vm545_vm8 = vcmp.eq.s32.totalorder %v1103_v37, %v536_v38  ;;  %v782_v39 = vsel %vm544_vm15, 1.0, %v953_v45  ;;  %v578_v42 = vmul.f32 %v881_v51, %v571_v40  ;;  %v790_v43 = vsel %vm241_vm5, 1.0, %v953_v45 }
 0x1fa   : > { %vm525_vm14 = vcmp.gt.s32.totalorder %v778_v36, 0  ;;  %v783_v10 = vsel %vm545_vm8, 1.0, %v953_v45  ;;  %v538_v11 = vsel %vm537_vm0, %v524_v24, 14  ;;  %v572_v46 = vmul.f32 %v789_v19, %v782_v39 }
 0x1fb   : > { %v526_v41 = vsel %vm525_vm14, %v778_v36, 0  ;;  %v584_v48 = vadd.f32 %v1233_v30, %v578_v42  ;;  %v573_v47 = vmul.f32 %v790_v43, %v783_v10  ;;  %vm546_vm2 = vcmp.eq.s32.totalorder %v1103_v37, %v538_v11 }
 0x1fc   : > { %vm539_vm3 = vcmp.lt.s32.totalorder %v526_v41, 14  ;;  %v579_v12 = vmul.f32 %v1235_v53, %v572_v46  ;;  %v784_v51 = vsel %vm546_vm2, 1.0, %v953_v45  ;;  %v792_v30 = vsel %vm243_vm7, 1.0, %v953_v45 }
 0x1fd   : > { %v540_v3 = vsel %vm539_vm3, %v526_v41, 14  ;;  %v580_v50 = vmul.f32 %v1237_v35, %v573_v47  ;;  %v574_v54 = vmul.f32 %v791_v49, %v784_v51  ;;  %v954_v32 = vmov 1966171168  }
 0x1fe   : > { %vm547_vm4 = vcmp.eq.s32.totalorder %v1103_v37, %v540_v3  ;;  %v585_v13 = vadd.f32 %v584_v48, %v579_v12  ;;  %v653_v33 = vunpack.c.l.s4 %v954_v32  ;;  %vm669_vm5 = vcmp.lt.s32.totalorder %v221_v0, 256 }
 0x1ff   : > { %v785_v52 = vsel %vm547_vm4, 1.0, %v953_v45  ;;  %v581_v37 = vmul.f32 %v1241_v61, %v574_v54 }
 0x200   : > { %v586_v53 = vadd.f32 %v585_v13, %v580_v50  ;;  %v575_v58 = vmul.f32 %v792_v30, %v785_v52  ;;  %v654_v26 = vunpack.c.0.s8 %v653_v33 }
 0x202   : > { %v587_v62 = vadd.f32 %v586_v53, %v581_v37  ;;  %v582_v63 = vmul.f32 %v1243_v2, %v575_v58 }
 0x204   : > { %v588_v45 = vadd.f32 %v587_v62, %v582_v63 }
 0x206   : > { %v589_v61 = vrot.slane %v588_v45, 4 }
 0x208   : > { %v590_v21 = vadd.f32 %v589_v61, %v588_v45 }
 0x248   : > { %v608_v56 = vpop.permute.xlu1 %607 }
 0x249   : > { %v632_v5 = vmul.f32 %v608_v56, %v571_v40  ;;  %v657_v40 = vsub.s32 %v654_v26, %v1022_v1 }
 0x24a   : > { %v858_v59 = vpop.permute.xlu0 %857 }
 0x24b   : > { %v860_v14 = vunpack.i.h.bf16 %v858_v59  ;;  %v859_v60 = vunpack.i.l.bf16 %v858_v59 }
 0x24c   : > { %v613_v57 = vpop.permute.xlu1 %612 }
 0x24d   : > { %v631_v35 = vmul.f32 %v860_v14, %v1227_v44  ;;  %v630_v4 = vmul.f32 %v859_v60, %v1229_v31  ;;  %v633_v7 = vmul.f32 %v613_v57, %v572_v46  ;;  %v591_v44 = vrot.slane %v590_v21, 2 }
 0x24f   : > { %v637_v27 = vadd.f32 %v631_v35, %v630_v4  ;;  %v592_v28 = vadd.f32 %v591_v44, %v590_v21 }
 0x250   : > { %v618_v6 = vpop.permute.xlu1 %617 }
 0x251   : > { %v638_v8 = vadd.f32 %v637_v27, %v632_v5  ;;  %v634_v15 = vmul.f32 %v618_v6, %v573_v47  ;;  %v593_v36 = vrot.slane %v592_v28, 1 }
 0x253   : > { %v639_v9 = vadd.f32 %v638_v8, %v633_v7  ;;  %v594_v38 = vadd.f32 %v593_v36, %v592_v28 }
 0x254   : > { %v623_v55 = vpop.permute.xlu1 %622 }
 0x255   : > { %v640_v16 = vadd.f32 %v639_v9, %v634_v15  ;;  %v635_v17 = vmul.f32 %v623_v55, %v574_v54 }
 0x257   : > { %v641_v22 = vadd.f32 %v640_v16, %v635_v17 }
 0x258   : > { %v628_v2 = vpop.permute.xlu1 %627 }
 0x259   : > { %v636_v23 = vmul.f32 %v628_v2, %v575_v58 }
 0x25b   : > { %v642_v25 = vadd.f32 %v641_v22, %v636_v23 }
 0x25d   : > { %v643_v31 = vrot.slane %v642_v25, 4 }
 0x25f   : > { %v644_v29 = vadd.f32 %v643_v31, %v642_v25 }
 0x261   : > { %v645_v34 = vrot.slane %v644_v29, 2 }
 0x263   : > { %v646_v20 = vadd.f32 %v645_v34, %v644_v29 }
 0x265   : > { %v647_v18 = vrot.slane %v646_v20, 1 }
 0x267   : > { %v648_v24 = vadd.f32 %v647_v18, %v646_v20 }
 0x269   : > { %v651_v41 = vcombine.low %v594_v38, %v648_v24 }
 0x26b   : > { %v658_v19 = vrot.slane %v651_v41, %v657_v40 }
 0x26d   : > { %v665_v39 = vrot.slane %v658_v19, %v657_v40 }
 0x26f   : > { %671 = vst.msk [vmem:[%s177_s5] sm:$0x3] %vm669_vm5, %v665_v39 }
 0x270   : > { %903 = shalt.err (!%p900_p3)
}
 0x271   : > { %s904_s23 = scalar_lea.hbm %s685_s14, 32  ;;  %s908_s26 = scalar_lea.hbm %s1317_s2, 64 }
 0x272   : > { %p905_p4 = scmp.ne.s32.totalorder %s685_s14, %s904_s23  ;;  %p909_p9 = scmp.lt.s32.totalorder %s685_s14, %s1317_s2 }
 0x273   : > { %p910_p10 = scmp.lt.s32.totalorder %s908_s26, %s904_s23 }
 0x274   : > { %p906_p7 = pnand %p905_p4, %p1009_p5 }
 0x275   : > { %p911_p11 = por %p910_p10, %p909_p9 }
 0x276   : > { %p907_p8 = pneg %p906_p7 }
 0x278   : > { %p912_p12 = pnand %p911_p11, %p907_p8 }
 0x27a   : > { %915 = shalt.err (!%p912_p12)
}
 0x27b   : > { %813 = dma.vmem_to_hbm [thread:$0]  (%p1009_p5), %s688_s6, 32, %s685_s14, %s673_s16  }
 0x27c PF: > { %p819_p13 = scmp.ge.s32.totalorder %s950_s12, 2  ;;  %s699_s29 = sand.u32 1, %s938_s9  }
 0x27d   : > { %s700_s30 = scalar_lea.sflag [#allocation3], %s699_s29 }
 0x27e   : > { %p816_p0 = pnand %p819_p13, %p1013_p6 }
 0x280   : > { %p817_p1 = pneg %p816_p0 }
 0x282   : > { %933 = dma.done.wait (%p817_p1), %s700_s30, 32  }
 0x283   : > { %935 = vsyncadd (%p817_p1), %s700_s30, 4294967264  ;;  %p12_p2 = scmp.ge.s32.totalorder %s996_s15, 4   ;;  %s1320_s9 = smov %s942_s10 }
 0x284   : > { %s1321_s10 = smov %s946_s11  ;;  %s1322_s11 = smov %s1007_s18 }
 0x285   : > { %s1323_s12 = smov %s996_s15  ;;  %14 = sbr.rel (!%p12_p2) target bundleno = 3 (0x3), region = 66 }
 0x28a   :  { %705 = vsyncpa [#allocation3], 1 }
 0x28b   :  { %707 = vsyncpa [#allocation3 + $0x1], 1 }

</bundles_post_ra>
